<compile_context>
chip_gen: v7x
topology: tpu7x:2x2x1
jax: 0.10.0
libtpu: 0.0.40
codegen_flags: <defaults>
</compile_context>

<pallas_src>
import functools

import jax
import jax.numpy as jnp
from jax.experimental import pallas as pl
from jax.experimental.pallas import tpu as pltpu


# ----------------------------- kernels --------------------------------------


def _blockdiag_kernel(x_ref, w_ref, o_ref):
    # x_ref: (TB, nb*din), w_ref: (nb*din, nb*dout), o_ref: (TB, nb*dout)
    o_ref[...] = jnp.dot(
        x_ref[...], w_ref[...], preferred_element_type=jnp.float32
    ).astype(o_ref.dtype)


def _perblock_kernel(x_ref, w_ref, o_ref, *, num_blocks, din, dout):
    # x_ref: (TB, nb*din), w_ref: (nb, din, dout), o_ref: (TB, nb*dout)
    for k in range(num_blocks):  # static unroll; num_blocks is small
        o_ref[:, k * dout:(k + 1) * dout] = jnp.dot(
            x_ref[:, k * din:(k + 1) * din],
            w_ref[k],
            preferred_element_type=jnp.float32,
        ).astype(o_ref.dtype)


# ----------------------------- sizing helpers --------------------------------


def _padded_vmem_bytes(shape, itemsize):
    """VMEM footprint of one buffer, padding the last two dims to the
    (sublane, 128-lane) tile granularity."""
    dims = list(shape)
    if not dims:
        return itemsize
    dims[-1] = -(-dims[-1] // 128) * 128
    if len(dims) >= 2:
        sub = max(8, 32 // max(itemsize, 1))  # 8 for f32, 16 for bf16
        dims[-2] = -(-dims[-2] // sub) * sub
    n = 1
    for d in dims:
        n *= d
    return n * itemsize


def _vmem_capacity_bytes():
    try:
        info = pltpu.get_tpu_info()
        cap = getattr(info, "vmem_capacity_bytes", None)
        if cap:
            return int(cap)
    except Exception:
        pass
    return 64 * 1024 * 1024  # conservative fallback = v7x per-TensorCore VMEM


def _pick_batch_tile(batch, x_cols, out_cols, w_shape, itemsize, budget_bytes,
                     max_tile=1024):
    """Largest batch tile whose (tile-padded) VMEM footprint fits the budget.
    x/out are double-buffered; weights are single-buffered (Buffered(1))."""
    w_bytes = _padded_vmem_bytes(w_shape, itemsize)

    def fits(tb):
        return (w_bytes
                + 2 * _padded_vmem_bytes((tb, x_cols), itemsize)
                + 2 * _padded_vmem_bytes((tb, out_cols), itemsize)
                ) <= budget_bytes

    if batch <= 8:
        return batch  # block == full dim; trivially small

    hi = min(batch, max_tile)
    if batch >= 16:
        # Guarantee >= 2 grid steps so the "parallel" axis can shard across
        # v7x's 2 TensorCores (harmless no-op on v5e/v6e).
        hi = min(hi, batch // 2)
    hi = max(8, hi // 8 * 8)

    for tb in range(hi, 7, -8):  # prefer exact divisors of batch
        if batch % tb == 0 and fits(tb):
            return tb
    for tb in range(hi, 7, -8):  # otherwise allow a ragged last block
        if fits(tb):
            return tb
    return 8


def _single_buffer_mode():
    buffered = getattr(pl, "Buffered", None)
    if buffered is None:
        return None
    try:
        return buffered(1)  # weights never change across grid steps
    except Exception:
        return None


# ----------------------------- wrapper ---------------------------------------


def group_linear_layer(x, w):
    """x: (batch, num_blocks, din), w: (num_blocks, din, dout)
    returns (batch, num_blocks, dout) -- same math as torch permute/bmm/permute."""
    batch, num_blocks, din = x.shape
    nb_w, din_w, dout = w.shape
    assert nb_w == num_blocks and din_w == din

    itemsize = jnp.dtype(x.dtype).itemsize
    cap = _vmem_capacity_bytes()
    vmem_limit = int(min(max(cap * 3 // 4, 32 * 1024 * 1024), 100 * 1024 * 1024))
    budget = int(min(cap // 2, 64 * 1024 * 1024))

    x_cols = num_blocks * din
    out_cols = num_blocks * dout

    # Path selection: block-diagonal single matmul when din/dout are lane-sparse
    # and the expanded weight stays small; otherwise per-block direct stores.
    bd_shape = (num_blocks * din, num_blocks * dout)
    use_blockdiag = (
        min(din, dout) < 128
        and _padded_vmem_bytes(bd_shape, itemsize) <= max(budget // 4, 4 << 20)
    )

    if use_blockdiag:
        eye = jnp.eye(num_blocks, dtype=w.dtype)
        w_arg = (w[:, None, :, :] * eye[:, :, None, None]).transpose(0, 2, 1, 3)
        w_arg = w_arg.reshape(num_blocks * din, num_blocks * dout)
        w_block_shape = bd_shape
        w_index_map = lambda i: (0, 0)
        kernel = _blockdiag_kernel
        mxu_flops = 2 * batch * (num_blocks * din) * (num_blocks * dout)
    else:
        w_arg = w
        w_block_shape = (num_blocks, din, dout)
        w_index_map = lambda i: (0, 0, 0)
        kernel = functools.partial(
            _perblock_kernel, num_blocks=num_blocks, din=din, dout=dout
        )
        mxu_flops = 2 * batch * num_blocks * din * dout

    tb = _pick_batch_tile(batch, x_cols, out_cols, w_block_shape, itemsize, budget)
    num_tiles = pl.cdiv(batch, tb)

    x_flat = x.reshape(batch, x_cols)  # free, contiguous, lane-dense

    cost = pl.CostEstimate(
        flops=mxu_flops,
        transcendentals=0,
        bytes_accessed=(x_flat.size * itemsize
                        + w_arg.size * jnp.dtype(w_arg.dtype).itemsize
                        + batch * out_cols * itemsize),
    )

    x_spec = pl.BlockSpec((tb, x_cols), lambda i: (i, 0))
    out_spec = pl.BlockSpec((tb, out_cols), lambda i: (i, 0))

    def _run(weight_mode):
        w_kwargs = {} if weight_mode is None else {"pipeline_mode": weight_mode}
        w_spec = pl.BlockSpec(w_block_shape, w_index_map, **w_kwargs)
        return pl.pallas_call(
            kernel,
            out_shape=jax.ShapeDtypeStruct((batch, out_cols), x.dtype),
            grid_spec=pl.GridSpec(
                grid=(num_tiles,),
                in_specs=[x_spec, w_spec],
                out_specs=out_spec,
            ),
            compiler_params=pltpu.CompilerParams(
                dimension_semantics=("parallel",),
                vmem_limit_bytes=vmem_limit,
            ),
            cost_estimate=cost,
        )(x_flat, w_arg)

    weight_mode = _single_buffer_mode()
    try:
        out_flat = _run(weight_mode)
    except Exception:
        if weight_mode is None:
            raise
        out_flat = _run(None)  # older JAX without single-buffer pipeline_mode

    # free, contiguous reshape back to (batch, num_blocks, dout)
    return out_flat.reshape(batch, num_blocks, dout)


# ----------------------------- self-test --------------------------------------


if __name__ == "__main__":
    key = jax.random.PRNGKey(0)
    kx, kw, kx2, kw2 = jax.random.split(key, 4)

    # Small shapes consistent with the module's forward (block-diagonal path).
    batch, num_blocks, din, dout = 8, 4, 16, 32
    x = jax.random.normal(kx, (batch, num_blocks, din), dtype=jnp.float32)
    # mirrors 0.01 * randn(num_blocks, din, dout)
    w = 0.01 * jax.random.normal(kw, (num_blocks, din, dout), dtype=jnp.float32)

    y = group_linear_layer(x, w)
    jax.block_until_ready(y)
    y_ref = jnp.einsum("bkd,kde->bke", x, w)
    assert y.shape == (batch, num_blocks, dout)
    assert jnp.allclose(y, y_ref, atol=1e-5, rtol=1e-5)

    # Exercise the per-block (large din/dout) path as well.
    b2, nb2, di2, do2 = 32, 2, 128, 128
    x2 = jax.random.normal(kx2, (b2, nb2, di2), dtype=jnp.float32)
    w2 = 0.01 * jax.random.normal(kw2, (nb2, di2, do2), dtype=jnp.float32)
    y2 = group_linear_layer(x2, w2)
    jax.block_until_ready(y2)
    y2_ref = jnp.einsum("bkd,kde->bke", x2, w2)
    assert jnp.allclose(y2, y2_ref, atol=1e-4, rtol=1e-4)

    print("KERNEL_OK")
</pallas_src>

<mosaic_0001>
module attributes {stable_mosaic.version = 11 : i64} {
  func.func @_blockdiag_kernel(%arg0: i32, %arg1: memref<8x64xf32, #tpu.memory_space<vmem>>, %arg2: memref<64x128xf32, #tpu.memory_space<vmem>>, %arg3: memref<8x128xf32, #tpu.memory_space<vmem>>) attributes {dimension_semantics = [#tpu.dimension_semantics<parallel>], iteration_bounds = array<i64: 1>, scalar_prefetch = 0 : i64, scratch_operands = 0 : i64, tpu.core_type = #tpu.core_type<tc>, window_params = [{transform_indices = @transform_0, window_bounds = array<i64: 8, 64>}, {pipeline_mode = #tpu.pipeline_mode<synchronous>, transform_indices = @transform_1, window_bounds = array<i64: 64, 128>}, {transform_indices = @transform_2, window_bounds = array<i64: 8, 128>}]} {
    %c0 = arith.constant 0 : index
    %c0_0 = arith.constant 0 : index
    %0 = vector.load %arg1[%c0, %c0_0] : memref<8x64xf32, #tpu.memory_space<vmem>>, vector<8x64xf32>
    %c0_1 = arith.constant 0 : index
    %c0_2 = arith.constant 0 : index
    %1 = vector.load %arg2[%c0_1, %c0_2] : memref<64x128xf32, #tpu.memory_space<vmem>>, vector<64x128xf32>
    %cst = arith.constant dense<0.000000e+00> : vector<8x128xf32>
    %2 = tpu.matmul %0, %1, %cst {dimension_numbers = #tpu.dot_dimension_numbers<[1], [0], [0], [1], [0, 0, 1, 1], [], []>} : vector<8x64xf32>, vector<64x128xf32>, vector<8x128xf32> -> vector<8x128xf32>
    %c0_3 = arith.constant 0 : index
    %c0_4 = arith.constant 0 : index
    %3 = vector.load %arg3[%c0_3, %c0_4] : memref<8x128xf32, #tpu.memory_space<vmem>>, vector<8x128xf32>
    tpu.vector_store %arg3[%c0_3, %c0_4], %2 {strides = array<i32>} : memref<8x128xf32, #tpu.memory_space<vmem>>, vector<8x128xf32>,
    return
  }
  func.func @transform_0(%arg0: i32) -> (i32, i32) {
    %c0_i32 = arith.constant 0 : i32
    %c0_i32_0 = arith.constant 0 : i32
    return %arg0, %c0_i32 : i32, i32
  }
  func.func @transform_1(%arg0: i32) -> (i32, i32) {
    %c0_i32 = arith.constant 0 : i32
    %c0_i32_0 = arith.constant 0 : i32
    %c0_i32_1 = arith.constant 0 : i32
    return %c0_i32, %c0_i32_0 : i32, i32
  }
  func.func @transform_2(%arg0: i32) -> (i32, i32) {
    %c0_i32 = arith.constant 0 : i32
    %c0_i32_0 = arith.constant 0 : i32
    return %arg0, %c0_i32 : i32, i32
  }
}

module attributes {stable_mosaic.version = 11 : i64} {
  func.func @_blockdiag_kernel(%arg0: i32, %arg1: memref<8x64xf32, #tpu.memory_space<vmem>>, %arg2: memref<64x128xf32, #tpu.memory_space<vmem>>, %arg3: memref<8x128xf32, #tpu.memory_space<vmem>>) attributes {dimension_semantics = [#tpu.dimension_semantics<parallel>], iteration_bounds = array<i64: 1>, scalar_prefetch = 0 : i64, scratch_operands = 0 : i64, tpu.core_type = #tpu.core_type<tc>, window_params = [{transform_indices = @transform_0, window_bounds = array<i64: 8, 64>}, {pipeline_mode = #tpu.pipeline_mode<synchronous>, transform_indices = @transform_1, window_bounds = array<i64: 64, 128>}, {transform_indices = @transform_2, window_bounds = array<i64: 8, 128>}]} {
    %c0 = arith.constant 0 : index
    %c0_0 = arith.constant 0 : index
    %0 = vector.load %arg1[%c0, %c0_0] : memref<8x64xf32, #tpu.memory_space<vmem>>, vector<8x64xf32>
    %c0_1 = arith.constant 0 : index
    %c0_2 = arith.constant 0 : index
    %1 = vector.load %arg2[%c0_1, %c0_2] : memref<64x128xf32, #tpu.memory_space<vmem>>, vector<64x128xf32>
    %cst = arith.constant dense<0.000000e+00> : vector<8x128xf32>
    %2 = tpu.matmul %0, %1, %cst {dimension_numbers = #tpu.dot_dimension_numbers<[1], [0], [0], [1], [0, 0, 1, 1], [], []>} : vector<8x64xf32>, vector<64x128xf32>, vector<8x128xf32> -> vector<8x128xf32>
    %c0_3 = arith.constant 0 : index
    %c0_4 = arith.constant 0 : index
    %3 = vector.load %arg3[%c0_3, %c0_4] : memref<8x128xf32, #tpu.memory_space<vmem>>, vector<8x128xf32>
    tpu.vector_store %arg3[%c0_3, %c0_4], %2 {strides = array<i32>} : memref<8x128xf32, #tpu.memory_space<vmem>>, vector<8x128xf32>,
    return
  }
  func.func @transform_0(%arg0: i32) -> (i32, i32) {
    %c0_i32 = arith.constant 0 : i32
    %c0_i32_0 = arith.constant 0 : i32
    return %arg0, %c0_i32 : i32, i32
  }
  func.func @transform_1(%arg0: i32) -> (i32, i32) {
    %c0_i32 = arith.constant 0 : i32
    %c0_i32_0 = arith.constant 0 : i32
    %c0_i32_1 = arith.constant 0 : i32
    return %c0_i32, %c0_i32_0 : i32, i32
  }
  func.func @transform_2(%arg0: i32) -> (i32, i32) {
    %c0_i32 = arith.constant 0 : i32
    %c0_i32_0 = arith.constant 0 : i32
    return %arg0, %c0_i32 : i32, i32
  }
}

</mosaic_0001>

<bundles_post_ra>
// kernel: tpu_custom_call.1
= control target key start
LH: loop header
LB: loop body
LE: loop exit
PB: predicated region body
PF: predicated region fallthrough
CT: control target
= control target key end

     0   :  { %7 = vsyncpa [#allocation3], 0  ;;  %s325_s0 = inlined_call_operand.hbm [shape: f32[8,64], index: 0, kind: input, shape index: {}]   ;;  %s326_s1 = inlined_call_operand.hbm [shape: f32[64,128], index: 1, kind: input, shape index: {}]   ;;  %s327_s2 = inlined_call_operand.hbm [shape: f32[8,128], index: 2, kind: output, shape index: {}]  }
   0x1   :  { %8 = vsyncpa [#allocation6], 0 }
   0x2   :  { %9 = vsyncpa [#allocation4], 0  ;;  %s259_s9 = smov [#allocation2]   ;;  %s260_s11 = smov [#allocation5]  }
   0x3   :  { %s16_s10 = sshll.u32 %s259_s9, 4  ;;  %s25_s12 = sshll.u32 %s260_s11, 4  ;;  %s17_s10 = int_to_ptr.vmem [resolvable:$true] %s16_s10  ;;  %s282_s12 = int_to_ptr.vmem [resolvable:$true] %s25_s12 }
   0x4   :  { %s187_s15 = scalar_lea.hbm %s325_s0, 128 }
   0x5   :  { %p188_p0 = scmp.ne.s32.totalorder %s325_s0, %s187_s15  ;;  %p191_p1 = scmp.lt.u32.totalorder %s187_s15, %s325_s0 }
   0x7   :  { %p193_p2 = pnand %p191_p1, %p188_p0 }
   0x9   :  { %196 = shalt.err (!%p193_p2)
}
   0xa   :  { %s197_s20 = scalar_lea.vmem %s17_s10, 128  ;;  %p202_p4 = scmp.lt.s32.totalorder %s17_s10, %s17_s10 }
   0xb   :  { %p198_p3 = scmp.ne.s32.totalorder %s17_s10, %s197_s20  ;;  %p203_p5 = scmp.lt.s32.totalorder %s197_s20, %s197_s20 }
   0xd   :  { %p204_p6 = por %p203_p5, %p202_p4 }
   0xf   :  { %p205_p7 = pnand %p204_p6, %p198_p3 }
  0x11   :  { %208 = shalt.err (!%p205_p7)
}
  0x12   :  { %19 = dma.hbm_to_vmem [thread:$0]  %s325_s0, 128, %s17_s10, [#allocation3]  }
  0x13   :  { %s209_s25 = scalar_lea.hbm %s326_s1, 1024 }
  0x14   :  { %p210_p8 = scmp.ne.s32.totalorder %s326_s1, %s209_s25  ;;  %p213_p9 = scmp.lt.u32.totalorder %s209_s25, %s326_s1 }
  0x16   :  { %p215_p10 = pnand %p213_p9, %p210_p8 }
  0x18   :  { %218 = shalt.err (!%p215_p10)
}
  0x19   :  { %s219_s30 = scalar_lea.vmem %s282_s12, 1024  ;;  %p224_p12 = scmp.lt.s32.totalorder %s282_s12, %s282_s12 }
  0x1a   :  { %p220_p11 = scmp.ne.s32.totalorder %s282_s12, %s219_s30  ;;  %p225_p13 = scmp.lt.s32.totalorder %s219_s30, %s219_s30 }
  0x1c   :  { %p226_p0 = por %p225_p13, %p224_p12 }
  0x1e   :  { %p227_p1 = pnand %p226_p0, %p220_p11 }
  0x20   :  { %230 = shalt.err (!%p227_p1)
}
  0x21   :  { %s261_s0 = smov 128   ;;  %s262_s3 = smov 8  }
  0x22   :  { %31 = dma.hbm_to_vmem [thread:$0]  %s326_s1, 1024, %s282_s12, [#allocation6], %s261_s0, %s261_s0, %s262_s3  }
  0x23   :  { %253 = dma.done.wait [#allocation3], 128  }
  0x24   :  { %254 = vsyncadd [#allocation3], 4294967168 }
  0x25   :  { %255 = dma.done.wait [#allocation6], 1024  }
  0x26   :  { %256 = vsyncadd [#allocation6], 4294966272  ;;  %v263_v0 = vmov 0.0|0.0   ;;  %vm264_vm0 = vmmov 0   ;;  %v265_v1 = vmov 0.0   ;;  %v39_v2 = vld [vmem:[#allocation5] sm:$0xff] }
  0x27   :  { %167 = vmatprep.subr.bf16.mxu0 %v263_v0  ;;  %164 = vmatprep.mubr.msk.f32.mxu0 %vm264_vm0, %v265_v1  ;;  %v40_v3 = vld [vmem:[#allocation5 + $0x8] sm:$0xff]  ;;  %v41_v4 = vld [vmem:[#allocation5 + $0x10] sm:$0xff]  ;;  %v42_v6 = vld [vmem:[#allocation5 + $0x18] sm:$0xff]  ;;  %vm47_vm1 = vcmask 523264   ;;  %s266_s1 = smov [#allocation7]  }
  0x28   :  { %v168_v5 = vpack.c.bf16 %v40_v3, %v39_v2  ;;  %v171_v7 = vpack.c.bf16 %v42_v6, %v41_v4  ;;  %v43_v8 = vld [vmem:[#allocation5 + $0x20] sm:$0xff]  ;;  %v44_v9 = vld [vmem:[#allocation5 + $0x28] sm:$0xff]  ;;  %v45_v11 = vld [vmem:[#allocation5 + $0x30] sm:$0xff]  ;;  %s128_s6 = sshll.u32 %s266_s1, 4  ;;  %s129_s6 = int_to_ptr.vmem [resolvable:$true] %s128_s6 }
  0x29   :  { %v174_v10 = vpack.c.bf16 %v44_v9, %v43_v8  ;;  %v46_v12 = vld [vmem:[#allocation5 + $0x38] sm:$0xff]  ;;  %s231_s7 = scalar_lea.vmem %s129_s6, 128  ;;  %p236_p3 = scmp.lt.s32.totalorder %s129_s6, %s129_s6 }
  0x2a   :  { %169 = vmatpush3.bf16.msra.mxu0 %v168_v5  ;;  %v177_v13 = vpack.c.bf16 %v46_v12, %v45_v11  ;;  %v38_v14 = vld [vmem:[#allocation2] sm:$0xff]  ;;  %p232_p2 = scmp.ne.s32.totalorder %s129_s6, %s231_s7  ;;  %p237_p4 = scmp.lt.s32.totalorder %s231_s7, %s231_s7 }
  0x2b   :  { %170 = vmatprep.subr.bf16.mxu0 %v263_v0 }
  0x2c   :  { %p238_p5 = por %p237_p4, %p236_p3 }
  0x2e   :  { %172 = vmatpush3.bf16.msra.mxu0 %v171_v7  ;;  %p239_p6 = pnand %p238_p5, %p232_p2 }
  0x2f   :  { %173 = vmatprep.subr.bf16.mxu0 %v263_v0 }
  0x32   :  { %175 = vmatpush3.bf16.msra.mxu0 %v174_v10 }
  0x33   :  { %176 = vmatprep.subr.bf16.mxu0 %v263_v0 }
  0x36   :  { %178 = vmatpush3.bf16.msra.mxu0 %v177_v13 }
  0x39   :  { %165 = vmatmul.mubr.msk.f32.vlgmr.msra.gmra.mrb[0].mxu0 %vm47_vm1, %v38_v14 }
 0x10c   :  { %v117_v15 = vpop.f32.mrb[0].mxu0 }
 0x10d   :  { %121 = vst [vmem:[#allocation7] sm:$0xff] %v117_v15  ;;  %v166_v16 = vpop.f32.mrb[1].mxu0 }
 0x10e   :  { %242 = shalt.err (!%p239_p6)
}
 0x10f   :  { %s243_s10 = scalar_lea.hbm %s327_s2, 128 }
 0x110   :  { %p244_p7 = scmp.ne.s32.totalorder %s327_s2, %s243_s10  ;;  %p247_p8 = scmp.lt.u32.totalorder %s243_s10, %s327_s2 }
 0x112   :  { %p249_p9 = pnand %p247_p8, %p244_p7 }
 0x114   :  { %252 = shalt.err (!%p249_p9)
}
 0x115   :  { %131 = dma.vmem_to_hbm [thread:$0]  %s129_s6, 128, %s327_s2, [#allocation4]  }
 0x116   :  { %257 = dma.done.wait [#allocation4], 128  }
 0x117   :  { %258 = vsyncadd [#allocation4], 4294967168 }
 0x118   :  { %135 = vsyncpa [#allocation3], 1 }
 0x119   :  { %136 = vsyncpa [#allocation6], 1 }
 0x11a   :  { %137 = vsyncpa [#allocation4], 1 }

// kernel: tpu_custom_call.1
= control target key start
LH: loop header
LB: loop body
LE: loop exit
PB: predicated region body
PF: predicated region fallthrough
CT: control target
= control target key end

     0   :  { %7 = vsyncpa [#allocation3], 0  ;;  %s325_s0 = inlined_call_operand.hbm [shape: f32[8,64], index: 0, kind: input, shape index: {}]   ;;  %s326_s1 = inlined_call_operand.hbm [shape: f32[64,128], index: 1, kind: input, shape index: {}]   ;;  %s327_s2 = inlined_call_operand.hbm [shape: f32[8,128], index: 2, kind: output, shape index: {}]  }
   0x1   :  { %8 = vsyncpa [#allocation6], 0 }
   0x2   :  { %9 = vsyncpa [#allocation4], 0  ;;  %s259_s9 = smov [#allocation2]   ;;  %s260_s11 = smov [#allocation5]  }
   0x3   :  { %s16_s10 = sshll.u32 %s259_s9, 4  ;;  %s25_s12 = sshll.u32 %s260_s11, 4  ;;  %s17_s10 = int_to_ptr.vmem [resolvable:$true] %s16_s10  ;;  %s282_s12 = int_to_ptr.vmem [resolvable:$true] %s25_s12 }
   0x4   :  { %s187_s15 = scalar_lea.hbm %s325_s0, 128 }
   0x5   :  { %p188_p0 = scmp.ne.s32.totalorder %s325_s0, %s187_s15  ;;  %p191_p1 = scmp.lt.u32.totalorder %s187_s15, %s325_s0 }
   0x7   :  { %p193_p2 = pnand %p191_p1, %p188_p0 }
   0x9   :  { %196 = shalt.err (!%p193_p2)
}
   0xa   :  { %s197_s20 = scalar_lea.vmem %s17_s10, 128  ;;  %p202_p4 = scmp.lt.s32.totalorder %s17_s10, %s17_s10 }
   0xb   :  { %p198_p3 = scmp.ne.s32.totalorder %s17_s10, %s197_s20  ;;  %p203_p5 = scmp.lt.s32.totalorder %s197_s20, %s197_s20 }
   0xd   :  { %p204_p6 = por %p203_p5, %p202_p4 }
   0xf   :  { %p205_p7 = pnand %p204_p6, %p198_p3 }
  0x11   :  { %208 = shalt.err (!%p205_p7)
}
  0x12   :  { %19 = dma.hbm_to_vmem [thread:$0]  %s325_s0, 128, %s17_s10, [#allocation3]  }
  0x13   :  { %s209_s25 = scalar_lea.hbm %s326_s1, 1024 }
  0x14   :  { %p210_p8 = scmp.ne.s32.totalorder %s326_s1, %s209_s25  ;;  %p213_p9 = scmp.lt.u32.totalorder %s209_s25, %s326_s1 }
  0x16   :  { %p215_p10 = pnand %p213_p9, %p210_p8 }
  0x18   :  { %218 = shalt.err (!%p215_p10)
}
  0x19   :  { %s219_s30 = scalar_lea.vmem %s282_s12, 1024  ;;  %p224_p12 = scmp.lt.s32.totalorder %s282_s12, %s282_s12 }
  0x1a   :  { %p220_p11 = scmp.ne.s32.totalorder %s282_s12, %s219_s30  ;;  %p225_p13 = scmp.lt.s32.totalorder %s219_s30, %s219_s30 }
  0x1c   :  { %p226_p0 = por %p225_p13, %p224_p12 }
  0x1e   :  { %p227_p1 = pnand %p226_p0, %p220_p11 }
  0x20   :  { %230 = shalt.err (!%p227_p1)
}
  0x21   :  { %s261_s0 = smov 128   ;;  %s262_s3 = smov 8  }
  0x22   :  { %31 = dma.hbm_to_vmem [thread:$0]  %s326_s1, 1024, %s282_s12, [#allocation6], %s261_s0, %s261_s0, %s262_s3  }
  0x23   :  { %253 = dma.done.wait [#allocation3], 128  }
  0x24   :  { %254 = vsyncadd [#allocation3], 4294967168 }
  0x25   :  { %255 = dma.done.wait [#allocation6], 1024  }
  0x26   :  { %256 = vsyncadd [#allocation6], 4294966272  ;;  %v263_v0 = vmov 0.0|0.0   ;;  %vm264_vm0 = vmmov 0   ;;  %v265_v1 = vmov 0.0   ;;  %v39_v2 = vld [vmem:[#allocation5] sm:$0xff] }
  0x27   :  { %167 = vmatprep.subr.bf16.mxu0 %v263_v0  ;;  %164 = vmatprep.mubr.msk.f32.mxu0 %vm264_vm0, %v265_v1  ;;  %v40_v3 = vld [vmem:[#allocation5 + $0x8] sm:$0xff]  ;;  %v41_v4 = vld [vmem:[#allocation5 + $0x10] sm:$0xff]  ;;  %v42_v6 = vld [vmem:[#allocation5 + $0x18] sm:$0xff]  ;;  %vm47_vm1 = vcmask 523264   ;;  %s266_s1 = smov [#allocation7]  }
  0x28   :  { %v168_v5 = vpack.c.bf16 %v40_v3, %v39_v2  ;;  %v171_v7 = vpack.c.bf16 %v42_v6, %v41_v4  ;;  %v43_v8 = vld [vmem:[#allocation5 + $0x20] sm:$0xff]  ;;  %v44_v9 = vld [vmem:[#allocation5 + $0x28] sm:$0xff]  ;;  %v45_v11 = vld [vmem:[#allocation5 + $0x30] sm:$0xff]  ;;  %s128_s6 = sshll.u32 %s266_s1, 4  ;;  %s129_s6 = int_to_ptr.vmem [resolvable:$true] %s128_s6 }
  0x29   :  { %v174_v10 = vpack.c.bf16 %v44_v9, %v43_v8  ;;  %v46_v12 = vld [vmem:[#allocation5 + $0x38] sm:$0xff]  ;;  %s231_s7 = scalar_lea.vmem %s129_s6, 128  ;;  %p236_p3 = scmp.lt.s32.totalorder %s129_s6, %s129_s6 }
  0x2a   :  { %169 = vmatpush3.bf16.msra.mxu0 %v168_v5  ;;  %v177_v13 = vpack.c.bf16 %v46_v12, %v45_v11  ;;  %v38_v14 = vld [vmem:[#allocation2] sm:$0xff]  ;;  %p232_p2 = scmp.ne.s32.totalorder %s129_s6, %s231_s7  ;;  %p237_p4 = scmp.lt.s32.totalorder %s231_s7, %s231_s7 }
  0x2b   :  { %170 = vmatprep.subr.bf16.mxu0 %v263_v0 }
  0x2c   :  { %p238_p5 = por %p237_p4, %p236_p3 }
  0x2e   :  { %172 = vmatpush3.bf16.msra.mxu0 %v171_v7  ;;  %p239_p6 = pnand %p238_p5, %p232_p2 }
  0x2f   :  { %173 = vmatprep.subr.bf16.mxu0 %v263_v0 }
  0x32   :  { %175 = vmatpush3.bf16.msra.mxu0 %v174_v10 }
  0x33   :  { %176 = vmatprep.subr.bf16.mxu0 %v263_v0 }
  0x36   :  { %178 = vmatpush3.bf16.msra.mxu0 %v177_v13 }
  0x39   :  { %165 = vmatmul.mubr.msk.f32.vlgmr.msra.gmra.mrb[0].mxu0 %vm47_vm1, %v38_v14 }
 0x10c   :  { %v117_v15 = vpop.f32.mrb[0].mxu0 }
 0x10d   :  { %121 = vst [vmem:[#allocation7] sm:$0xff] %v117_v15  ;;  %v166_v16 = vpop.f32.mrb[1].mxu0 }
 0x10e   :  { %242 = shalt.err (!%p239_p6)
}
 0x10f   :  { %s243_s10 = scalar_lea.hbm %s327_s2, 128 }
 0x110   :  { %p244_p7 = scmp.ne.s32.totalorder %s327_s2, %s243_s10  ;;  %p247_p8 = scmp.lt.u32.totalorder %s243_s10, %s327_s2 }
 0x112   :  { %p249_p9 = pnand %p247_p8, %p244_p7 }
 0x114   :  { %252 = shalt.err (!%p249_p9)
}
 0x115   :  { %131 = dma.vmem_to_hbm [thread:$0]  %s129_s6, 128, %s327_s2, [#allocation4]  }
 0x116   :  { %257 = dma.done.wait [#allocation4], 128  }
 0x117   :  { %258 = vsyncadd [#allocation4], 4294967168 }
 0x118   :  { %135 = vsyncpa [#allocation3], 1 }
 0x119   :  { %136 = vsyncpa [#allocation6], 1 }
 0x11a   :  { %137 = vsyncpa [#allocation4], 1 }

</bundles_post_ra>
